<compile_context>
chip_gen: v7x
topology: tpu7x:2x2x1
jax: 0.10.0
libtpu: 0.0.40
codegen_flags: <defaults>
</compile_context>

<pallas_src>
import functools

import jax
import jax.numpy as jnp
from jax.experimental import pallas as pl
from jax.experimental.pallas import tpu as pltpu


def _round_up(x, m):
    return (x + m - 1) // m * m


def _cdiv(a, b):
    return (a + b - 1) // b


_HAS_BUFFERED = hasattr(pl, "Buffered")


def _spec(shape, index_map, buffers=None):
    """BlockSpec with optional explicit buffer depth (feature-checked)."""
    if buffers is None or not _HAS_BUFFERED:
        return pl.BlockSpec(shape, index_map)
    return pl.BlockSpec(shape, index_map, pipeline_mode=pl.Buffered(buffers))


def _vmem_budget_bytes():
    """Generation-aware VMEM budget with compiler headroom."""
    cap = 64 * 1024 * 1024
    try:
        cap = int(pltpu.get_tpu_info().vmem_capacity_bytes)
    except Exception:  # conservative fallback if the query is unavailable
        pass
    if cap <= 64 * 1024 * 1024:
        # v7x-class: 64 MiB physical per TensorCore; leave ~22% headroom.
        return int(cap * 0.78)
    # v5e/v6e-class: 128 MiB physical; leave ~15% headroom.
    return int(cap * 0.85)


def _mlp_geometry(H, D, compute_dtype, td_target, budget):
    """Decide feature padding and whether the mlp_dim needs chunking."""
    H_pad = _round_up(H, 128)
    D_128 = _round_up(D, 128)
    cbytes = jnp.dtype(compute_dtype).itemsize
    weight_bytes = 2 * H_pad * D_128 * cbytes + (D_128 + H_pad) * 4
    if weight_bytes <= int(0.6 * budget):
        # Weights fully VMEM-resident: one DMA total, no accumulator needed.
        n_d, tD = 1, D_128
    else:
        # Chunk mlp_dim with near-minimal padding.
        n_d = max(2, _cdiv(D_128, td_target))
        tD = _round_up(_cdiv(D_128, n_d), 128)
        n_d = _cdiv(D_128, tD)
    D_pad = n_d * tD
    return H_pad, D_pad, tD, n_d


def _vmem_usage(tm, tD, n_d, w_buf, H_pad, xbytes, obytes, cbytes):
    weights = 2 * H_pad * tD * cbytes * w_buf
    biases = (tD + H_pad) * 4 * (1 if n_d == 1 else 2)
    x_tile = tm * H_pad * xbytes * 2          # double-buffered input rows
    out_tile = tm * H_pad * obytes * 2        # double-buffered output rows
    acc = tm * H_pad * 4 if n_d > 1 else 0    # f32 accumulator scratch
    temps = tm * tD * (4 + cbytes) + tm * H_pad * 4   # fc1 f32 + cast + fc2 f32
    return weights + biases + x_tile + out_tile + acc + temps


# --------------------------- kernels -----------------------------------------


def _mlp_kernel_resident(x_ref, w1_ref, b1_ref, w2_ref, b2_ref, o_ref, *,
                         compute_dtype, approximate_gelu):
    """Single-pass kernel: full weights resident in VMEM, no accumulator."""
    x = x_ref[...].astype(compute_dtype)
    h = jnp.dot(x, w1_ref[...], preferred_element_type=jnp.float32)
    h = jax.nn.gelu(h + b1_ref[...], approximate=approximate_gelu)
    # TODO(synk): dropout is identity in eval mode; training-mode RNG mask
    # (pltpu.prng_*) intentionally omitted to match inference semantics.
    out = jnp.dot(h.astype(compute_dtype), w2_ref[...],
                  preferred_element_type=jnp.float32)
    o_ref[...] = (out + b2_ref[...]).astype(o_ref.dtype)


def _mlp_kernel_chunked(x_ref, w1_ref, b1_ref, w2_ref, b2_ref, o_ref, acc_ref, *,
                        compute_dtype, approximate_gelu):
    """D-chunked kernel: partial fc2 products accumulate in f32 scratch."""
    d = pl.program_id(1)

    @pl.when(d == 0)
    def _init():
        acc_ref[...] = jnp.zeros_like(acc_ref)

    x = x_ref[...].astype(compute_dtype)
    h = jnp.dot(x, w1_ref[...], preferred_element_type=jnp.float32)
    h = jax.nn.gelu(h + b1_ref[...], approximate=approximate_gelu)
    acc_ref[...] += jnp.dot(h.astype(compute_dtype), w2_ref[...],
                            preferred_element_type=jnp.float32)

    @pl.when(d == pl.num_programs(1) - 1)
    def _finalize():
        o_ref[...] = (acc_ref[...] + b2_ref[...]).astype(o_ref.dtype)


# --------------------------- host wrappers -----------------------------------


def prepare_mlp_params(w1, b1, w2, b2, *, compute_dtype=jnp.bfloat16,
                       td_target=512, vmem_budget=None):
    """Pad + cast weights once (hoisted out of the per-call path; cacheable)."""
    H, D = w1.shape
    budget = int(vmem_budget) if vmem_budget is not None else _vmem_budget_bytes()
    H_pad, D_pad, tD, n_d = _mlp_geometry(H, D, compute_dtype, td_target, budget)
    w1p = jnp.zeros((H_pad, D_pad), compute_dtype).at[:H, :D].set(
        w1.astype(compute_dtype))
    w2p = jnp.zeros((D_pad, H_pad), compute_dtype).at[:D, :H].set(
        w2.astype(compute_dtype))
    b1p = jnp.zeros((1, D_pad), jnp.float32).at[0, :D].set(b1.astype(jnp.float32))
    b2p = jnp.zeros((1, H_pad), jnp.float32).at[0, :H].set(b2.astype(jnp.float32))
    return {
        "w1": w1p, "b1": b1p, "w2": w2p, "b2": b2p,
        "H": H, "D": D, "H_pad": H_pad, "D_pad": D_pad, "tD": tD, "n_d": n_d,
        "compute_dtype": compute_dtype, "vmem_budget": budget,
    }


def mlp_pallas(x, params, *, tm=512, approximate_gelu=True, out_dtype=None):
    """x: (B, N, H) -> (B, N, H). Fused fc1 -> GELU -> fc2 (eval dropout = id)."""
    B, N, H = x.shape
    assert H == params["H"], (H, params["H"])
    M = B * N
    H_pad, D_pad = params["H_pad"], params["D_pad"]
    tD, n_d = params["tD"], params["n_d"]
    compute_dtype = params["compute_dtype"]
    budget = params["vmem_budget"]
    out_dtype = x.dtype if out_dtype is None else out_dtype

    xbytes = jnp.dtype(x.dtype).itemsize
    obytes = jnp.dtype(out_dtype).itemsize
    cbytes = jnp.dtype(compute_dtype).itemsize

    # ---- row tile ----------------------------------------------------------
    tm_eff = max(16, _round_up(min(tm, M), 16))
    # v7x megacore: keep >=2 row tiles so the "parallel" axis can shard across
    # both TensorCores (harmless on 1-TC v5e/v6e).
    if _cdiv(M, tm_eff) == 1 and M >= 32:
        tm_eff = max(16, _round_up(_cdiv(M, 2), 16))

    # ---- fit under the generation-aware VMEM budget -------------------------
    w_buf = 1 if n_d == 1 else (3 if n_d >= 3 else 2)
    while (n_d > 1 and w_buf > 2 and
           _vmem_usage(tm_eff, tD, n_d, w_buf, H_pad, xbytes, obytes, cbytes)
           > budget):
        w_buf -= 1
    while (_vmem_usage(tm_eff, tD, n_d, w_buf, H_pad, xbytes, obytes, cbytes)
           > budget and tm_eff > 128):
        tm_eff = max(128, _round_up(tm_eff // 2, 16))

    M_pad = _round_up(M, tm_eff)
    n_i = M_pad // tm_eff

    # ---- input rows: pad only when needed, keep original dtype --------------
    x2d = x.reshape(M, H)
    if M_pad != M or H_pad != H:
        x2d = jnp.zeros((M_pad, H_pad), x.dtype).at[:M, :H].set(x2d)

    # ---- cost estimate (accounts for weight re-streaming when n_d > 1) ------
    w_stream = 1 if n_d == 1 else n_i
    cost = pl.CostEstimate(
        flops=int(4 * M_pad * H_pad * D_pad),
        transcendentals=int(M_pad * D_pad),
        bytes_accessed=int(M_pad * H_pad * (xbytes + obytes)
                           + 2 * H_pad * D_pad * cbytes * w_stream
                           + (D_pad + H_pad) * 4 * w_stream),
    )

    if n_d == 1:
        kernel = functools.partial(_mlp_kernel_resident,
                                   compute_dtype=compute_dtype,
                                   approximate_gelu=approximate_gelu)
        grid = (n_i,)
        in_specs = [
            _spec((tm_eff, H_pad), lambda i: (i, 0)),              # x rows
            _spec((H_pad, D_pad), lambda i: (0, 0), buffers=1),    # w1 resident
            _spec((1, D_pad),     lambda i: (0, 0), buffers=1),    # b1 resident
            _spec((D_pad, H_pad), lambda i: (0, 0), buffers=1),    # w2 resident
            _spec((1, H_pad),     lambda i: (0, 0), buffers=1),    # b2 resident
        ]
        out_specs = pl.BlockSpec((tm_eff, H_pad), lambda i: (i, 0))
        scratch = []
        semantics = ("parallel",)
    else:
        kernel = functools.partial(_mlp_kernel_chunked,
                                   compute_dtype=compute_dtype,
                                   approximate_gelu=approximate_gelu)
        grid = (n_i, n_d)
        in_specs = [
            _spec((tm_eff, H_pad), lambda i, d: (i, 0)),               # x rows
            _spec((H_pad, tD), lambda i, d: (0, d), buffers=w_buf),    # w1 panel
            _spec((1, tD),     lambda i, d: (0, d)),                   # b1 panel
            _spec((tD, H_pad), lambda i, d: (d, 0), buffers=w_buf),    # w2 panel
            _spec((1, H_pad),  lambda i, d: (0, 0), buffers=1),        # b2 invariant
        ]
        out_specs = pl.BlockSpec((tm_eff, H_pad), lambda i, d: (i, 0))
        scratch = [pltpu.VMEM((tm_eff, H_pad), jnp.float32)]
        semantics = ("parallel", "arbitrary")

    out2d = pl.pallas_call(
        kernel,
        out_shape=jax.ShapeDtypeStruct((M_pad, H_pad), out_dtype),
        grid_spec=pltpu.PrefetchScalarGridSpec(
            num_scalar_prefetch=0,
            grid=grid,
            in_specs=in_specs,
            out_specs=out_specs,
            scratch_shapes=scratch,
        ),
        compiler_params=pltpu.CompilerParams(
            dimension_semantics=semantics,
            vmem_limit_bytes=int(budget)),
        cost_estimate=cost,
    )(x2d, params["w1"], params["b1"], params["w2"], params["b2"])

    return out2d[:M, :H].reshape(B, N, H)


def xavier_uniform(key, shape, dtype=jnp.float32):
    # Matches torch.nn.init.xavier_uniform_ for a Linear weight, built directly
    # as (fan_in, fan_out).
    fan_in, fan_out = shape
    limit = (6.0 / (fan_in + fan_out)) ** 0.5
    return jax.random.uniform(key, shape, dtype, minval=-limit, maxval=limit)


if __name__ == "__main__":
    # Small config consistent with the module: hidden_size=32, mlp_dim=64.
    B, N, H, D = 2, 8, 32, 64
    key = jax.random.PRNGKey(0)
    k_x, k_w1, k_b1, k_w2, k_b2 = jax.random.split(key, 5)

    x = jax.random.normal(k_x, (B, N, H), jnp.float32)
    w1 = xavier_uniform(k_w1, (H, D))                        # fc1 weight (in, out)
    b1 = 1e-6 * jax.random.normal(k_b1, (D,), jnp.float32)   # fc1 bias ~ N(0, 1e-6)
    w2 = xavier_uniform(k_w2, (D, H))                        # fc2 weight (in, out)
    b2 = 1e-6 * jax.random.normal(k_b2, (H,), jnp.float32)   # fc2 bias ~ N(0, 1e-6)

    # Pad + cast weights once (hoisted out of the per-call path).
    params = prepare_mlp_params(w1, b1, w2, b2)
    out = mlp_pallas(x, params, approximate_gelu=True)
    jax.block_until_ready(out)

    # Reference in plain JAX (eval-mode dropout = identity). bf16 MXU operands
    # with f32 accumulation => loose tolerance vs the f32 reference.
    ref = jax.nn.gelu(x @ w1 + b1, approximate=True) @ w2 + b2
    assert out.shape == (B, N, H)
    assert jnp.allclose(out, ref, atol=5e-2, rtol=5e-2), float(
        jnp.max(jnp.abs(out - ref)))

    print("KERNEL_OK")
</pallas_src>

<mosaic_0001>
module attributes {stable_mosaic.version = 11 : i64} {
  func.func @_mlp_kernel_resident(%arg0: i32, %arg1: memref<16x128xf32, #tpu.memory_space<vmem>>, %arg2: memref<128x128xbf16, #tpu.memory_space<vmem>>, %arg3: memref<1x128xf32, #tpu.memory_space<vmem>>, %arg4: memref<128x128xbf16, #tpu.memory_space<vmem>>, %arg5: memref<1x128xf32, #tpu.memory_space<vmem>>, %arg6: memref<16x128xf32, #tpu.memory_space<vmem>>) attributes {dimension_semantics = [#tpu.dimension_semantics<parallel>], iteration_bounds = array<i64: 1>, scalar_prefetch = 0 : i64, scratch_operands = 0 : i64, tpu.core_type = #tpu.core_type<tc>, window_params = [{transform_indices = @transform_0, window_bounds = array<i64: 16, 128>}, {pipeline_mode = #tpu.pipeline_mode<synchronous>, transform_indices = @transform_1, window_bounds = array<i64: 128, 128>}, {pipeline_mode = #tpu.pipeline_mode<synchronous>, transform_indices = @transform_2, window_bounds = array<i64: 1, 128>}, {pipeline_mode = #tpu.pipeline_mode<synchronous>, transform_indices = @transform_3, window_bounds = array<i64: 128, 128>}, {pipeline_mode = #tpu.pipeline_mode<synchronous>, transform_indices = @transform_4, window_bounds = array<i64: 1, 128>}, {transform_indices = @transform_5, window_bounds = array<i64: 16, 128>}]} {
    %c0 = arith.constant 0 : index
    %c0_0 = arith.constant 0 : index
    %0 = vector.load %arg1[%c0, %c0_0] : memref<16x128xf32, #tpu.memory_space<vmem>>, vector<16x128xf32>
    %1 = arith.truncf %0 : vector<16x128xf32> to vector<16x128xbf16>
    %c0_1 = arith.constant 0 : index
    %c0_2 = arith.constant 0 : index
    %2 = vector.load %arg2[%c0_1, %c0_2] : memref<128x128xbf16, #tpu.memory_space<vmem>>, vector<128x128xbf16>
    %cst = arith.constant dense<0.000000e+00> : vector<16x128xf32>
    %3 = tpu.matmul %1, %2, %cst {dimension_numbers = #tpu.dot_dimension_numbers<[1], [0], [0], [1], [0, 0, 1, 1], [], []>} : vector<16x128xbf16>, vector<128x128xbf16>, vector<16x128xf32> -> vector<16x128xf32>
    %c0_3 = arith.constant 0 : index
    %c0_4 = arith.constant 0 : index
    %4 = vector.load %arg3[%c0_3, %c0_4] : memref<1x128xf32, #tpu.memory_space<vmem>>, vector<1x128xf32>
    %5 = vector.broadcast %4 : vector<1x128xf32> to vector<16x128xf32>
    %6 = arith.addf %3, %5 : vector<16x128xf32>
    %7 = arith.mulf %6, %6 : vector<16x128xf32>
    %8 = arith.mulf %6, %7 : vector<16x128xf32>
    %cst_5 = arith.constant 4.471500e-02 : f32
    %9 = vector.broadcast %cst_5 : f32 to vector<16x128xf32>
    %10 = arith.mulf %9, %8 : vector<16x128xf32>
    %11 = arith.addf %6, %10 : vector<16x128xf32>
    %cst_6 = arith.constant 0.797884583 : f32
    %12 = vector.broadcast %cst_6 : f32 to vector<16x128xf32>
    %13 = arith.mulf %12, %11 : vector<16x128xf32>
    %14 = math.tanh %13 : vector<16x128xf32>
    %cst_7 = arith.constant 1.000000e+00 : f32
    %15 = vector.broadcast %cst_7 : f32 to vector<16x128xf32>
    %16 = arith.addf %15, %14 : vector<16x128xf32>
    %cst_8 = arith.constant 5.000000e-01 : f32
    %17 = vector.broadcast %cst_8 : f32 to vector<16x128xf32>
    %18 = arith.mulf %17, %16 : vector<16x128xf32>
    %19 = arith.mulf %6, %18 : vector<16x128xf32>
    %20 = arith.truncf %19 : vector<16x128xf32> to vector<16x128xbf16>
    %c0_9 = arith.constant 0 : index
    %c0_10 = arith.constant 0 : index
    %21 = vector.load %arg4[%c0_9, %c0_10] : memref<128x128xbf16, #tpu.memory_space<vmem>>, vector<128x128xbf16>
    %cst_11 = arith.constant dense<0.000000e+00> : vector<16x128xf32>
    %22 = tpu.matmul %20, %21, %cst_11 {dimension_numbers = #tpu.dot_dimension_numbers<[1], [0], [0], [1], [0, 0, 1, 1], [], []>} : vector<16x128xbf16>, vector<128x128xbf16>, vector<16x128xf32> -> vector<16x128xf32>
    %c0_12 = arith.constant 0 : index
    %c0_13 = arith.constant 0 : index
    %23 = vector.load %arg5[%c0_12, %c0_13] : memref<1x128xf32, #tpu.memory_space<vmem>>, vector<1x128xf32>
    %24 = vector.broadcast %23 : vector<1x128xf32> to vector<16x128xf32>
    %25 = arith.addf %22, %24 : vector<16x128xf32>
    %c0_14 = arith.constant 0 : index
    %c0_15 = arith.constant 0 : index
    %26 = vector.load %arg6[%c0_14, %c0_15] : memref<16x128xf32, #tpu.memory_space<vmem>>, vector<16x128xf32>
    tpu.vector_store %arg6[%c0_14, %c0_15], %25 {strides = array<i32>} : memref<16x128xf32, #tpu.memory_space<vmem>>, vector<16x128xf32>,
    return
  }
  func.func @transform_0(%arg0: i32) -> (i32, i32) {
    %c0_i32 = arith.constant 0 : i32
    %c0_i32_0 = arith.constant 0 : i32
    return %arg0, %c0_i32 : i32, i32
  }
  func.func @transform_1(%arg0: i32) -> (i32, i32) {
    %c0_i32 = arith.constant 0 : i32
    %c0_i32_0 = arith.constant 0 : i32
    %c0_i32_1 = arith.constant 0 : i32
    return %c0_i32, %c0_i32_0 : i32, i32
  }
  func.func @transform_2(%arg0: i32) -> (i32, i32) {
    %c0_i32 = arith.constant 0 : i32
    %c0_i32_0 = arith.constant 0 : i32
    %c0_i32_1 = arith.constant 0 : i32
    return %c0_i32, %c0_i32_0 : i32, i32
  }
  func.func @transform_3(%arg0: i32) -> (i32, i32) {
    %c0_i32 = arith.constant 0 : i32
    %c0_i32_0 = arith.constant 0 : i32
    %c0_i32_1 = arith.constant 0 : i32
    return %c0_i32, %c0_i32_0 : i32, i32
  }
  func.func @transform_4(%arg0: i32) -> (i32, i32) {
    %c0_i32 = arith.constant 0 : i32
    %c0_i32_0 = arith.constant 0 : i32
    %c0_i32_1 = arith.constant 0 : i32
    return %c0_i32, %c0_i32_0 : i32, i32
  }
  func.func @transform_5(%arg0: i32) -> (i32, i32) {
    %c0_i32 = arith.constant 0 : i32
    %c0_i32_0 = arith.constant 0 : i32
    return %arg0, %c0_i32 : i32, i32
  }
}

</mosaic_0001>

<bundles_post_ra>
// kernel: tpu_custom_call.1
= control target key start
LH: loop header
LB: loop body
LE: loop exit
PB: predicated region body
PF: predicated region fallthrough
CT: control target
= control target key end

     0   :  { %10 = vsyncpa [#allocation3], 0  ;;  %s635_s0 = inlined_call_operand.hbm [shape: f32[16,128], index: 0, kind: input, shape index: {}]   ;;  %s636_s1 = inlined_call_operand.hbm [shape: bf16[128,128], index: 1, kind: input, shape index: {}]   ;;  %s637_s2 = inlined_call_operand.vmem [shape: f32[1,128], index: 2, kind: input, shape index: {}]   ;;  %s638_s3 = inlined_call_operand.hbm [shape: bf16[128,128], index: 3, kind: input, shape index: {}]   ;;  %s639_s4 = inlined_call_operand.vmem [shape: f32[1,128], index: 4, kind: input, shape index: {}]   ;;  %s640_s5 = inlined_call_operand.hbm [shape: f32[16,128], index: 5, kind: output, shape index: {}]  }
   0x1   :  { %11 = vsyncpa [#allocation6], 0 }
   0x2   :  { %12 = vsyncpa [#allocation4], 0  ;;  %s529_s18 = smov [#allocation5]   ;;  %s435_s22 = scalar_lea.hbm %s636_s1, 1024 }
   0x3   :  { %s30_s19 = sshll.u32 %s529_s18, 4  ;;  %p436_p0 = scmp.ne.s32.totalorder %s636_s1, %s435_s22  ;;  %s31_s19 = int_to_ptr.vmem [resolvable:$true] %s30_s19 }
   0x4   :  { %p439_p1 = scmp.lt.u32.totalorder %s435_s22, %s636_s1 }
   0x6   :  { %p441_p2 = pnand %p439_p1, %p436_p0 }
   0x8   :  { %444 = shalt.err (!%p441_p2)
}
   0x9   :  { %s445_s27 = scalar_lea.vmem %s31_s19, 1024  ;;  %p450_p4 = scmp.lt.s32.totalorder %s31_s19, %s31_s19 }
   0xa   :  { %p446_p3 = scmp.ne.s32.totalorder %s31_s19, %s445_s27  ;;  %p451_p5 = scmp.lt.s32.totalorder %s445_s27, %s445_s27 }
   0xc   :  { %p452_p6 = por %p451_p5, %p450_p4 }
   0xe   :  { %p453_p7 = pnand %p452_p6, %p446_p3 }
  0x10   :  { %456 = shalt.err (!%p453_p7)
}
  0x11   :  { %s530_s28 = smov 64   ;;  %s531_s29 = smov 4  }
  0x12   :  { %36 = dma.hbm_to_vmem [thread:$0]  %s636_s1, 1024, %s31_s19, [#allocation6], %s530_s28, %s530_s28, %s531_s29  }
  0x13   :  { %s532_s7 = smov [#allocation2]   ;;  %s457_s11 = scalar_lea.hbm %s635_s0, 256 }
  0x14   :  { %s18_s8 = sshll.u32 %s532_s7, 4  ;;  %p458_p8 = scmp.ne.s32.totalorder %s635_s0, %s457_s11  ;;  %s19_s8 = int_to_ptr.vmem [resolvable:$true] %s18_s8 }
  0x15   :  { %p461_p9 = scmp.lt.u32.totalorder %s457_s11, %s635_s0 }
  0x17   :  { %p463_p10 = pnand %p461_p9, %p458_p8 }
  0x19   :  { %466 = shalt.err (!%p463_p10)
}
  0x1a   :  { %s467_s16 = scalar_lea.vmem %s19_s8, 256  ;;  %p472_p12 = scmp.lt.s32.totalorder %s19_s8, %s19_s8 }
  0x1b   :  { %p468_p11 = scmp.ne.s32.totalorder %s19_s8, %s467_s16  ;;  %p473_p13 = scmp.lt.s32.totalorder %s467_s16, %s467_s16 }
  0x1d   :  { %p474_p0 = por %p473_p13, %p472_p12 }
  0x1f   :  { %p475_p1 = pnand %p474_p0, %p468_p11 }
  0x21   :  { %478 = shalt.err (!%p475_p1)
}
  0x22   :  { %s533_s1 = smov 128   ;;  %s534_s17 = smov 8  }
  0x23   :  { %24 = dma.hbm_to_vmem [thread:$0]  %s635_s0, 256, %s19_s8, [#allocation3], %s533_s1, %s533_s1, %s534_s17  }
  0x24   :  { %s535_s20 = smov [#allocation7]   ;;  %s479_s24 = scalar_lea.hbm %s638_s3, 1024 }
  0x25   :  { %s44_s21 = sshll.u32 %s535_s20, 4  ;;  %p480_p2 = scmp.ne.s32.totalorder %s638_s3, %s479_s24  ;;  %s45_s21 = int_to_ptr.vmem [resolvable:$true] %s44_s21 }
  0x26   :  { %p483_p3 = scmp.lt.u32.totalorder %s479_s24, %s638_s3 }
  0x28   :  { %p485_p4 = pnand %p483_p3, %p480_p2 }
  0x2a   :  { %488 = shalt.err (!%p485_p4)
}
  0x2b   :  { %s489_s6 = scalar_lea.vmem %s45_s21, 1024  ;;  %p494_p6 = scmp.lt.s32.totalorder %s45_s21, %s45_s21 }
  0x2c   :  { %p490_p5 = scmp.ne.s32.totalorder %s45_s21, %s489_s6  ;;  %p495_p7 = scmp.lt.s32.totalorder %s489_s6, %s489_s6 }
  0x2e   :  { %p496_p8 = por %p495_p7, %p494_p6 }
  0x30   :  { %p497_p9 = pnand %p496_p8, %p490_p5 }
  0x32   :  { %500 = shalt.err (!%p497_p9)
}
  0x33   :  { %50 = dma.hbm_to_vmem [thread:$0]  %s638_s3, 1024, %s45_s21, [#allocation6], %s530_s28, %s530_s28, %s531_s29  }
  0x34   :  { %523 = dma.done.wait [#allocation3], 256  }
  0x35   :  { %524 = vsyncadd [#allocation3], 4294967040 }
  0x36   :  { %525 = dma.done.wait [#allocation6], 2048  }
  0x37   :  { %526 = vsyncadd [#allocation6], 4294965248  ;;  %v536_v0 = vmov 0.0   ;;  %vm537_vm0 = vmmov 0   ;;  %v415_v1 = vld [vmem:[#allocation5] sm:$0xff]   ;;  %v416_v2 = vld [vmem:[#allocation5 + $0x8] sm:$0xff]  }
  0x38   :  { %365 = vmatprep.subr.bf16.mxu0 %v536_v0  ;;  %381 = vmatprep.mubr.msk.bf16.mxu0 %vm537_vm0, %v536_v0  ;;  %v417_v3 = vld [vmem:[#allocation5 + $0x10] sm:$0xff]   ;;  %v418_v4 = vld [vmem:[#allocation5 + $0x18] sm:$0xff]   ;;  %v419_v5 = vld [vmem:[#allocation5 + $0x20] sm:$0xff]   ;;  %s538_s8 = smov [#allocation8]  }
  0x39   :  { %385 = vmatprep.subr.bf16.mxu1 %v536_v0  ;;  %401 = vmatprep.mubr.msk.bf16.mxu1 %vm537_vm0, %v536_v0  ;;  %v420_v6 = vld [vmem:[#allocation5 + $0x28] sm:$0xff]   ;;  %v421_v7 = vld [vmem:[#allocation5 + $0x30] sm:$0xff]   ;;  %v422_v8 = vld [vmem:[#allocation5 + $0x38] sm:$0xff]   ;;  %s316_s9 = sshll.u32 %s538_s8, 4  ;;  %s317_s9 = int_to_ptr.vmem [resolvable:$true] %s316_s9 }
  0x3a   :  { %366 = vmatpush3.bf16.msra.mxu0 %v415_v1  ;;  %v63_v9 = vld [vmem:[#allocation2] sm:$0xff]  ;;  %v64_v10 = vld [vmem:[#allocation2 + $0x8] sm:$0xff]  ;;  %v423_v12 = vld [vmem:[#allocation7] sm:$0xff]   ;;  %s501_s10 = scalar_lea.vmem %s317_s9, 256  ;;  %p506_p11 = scmp.lt.s32.totalorder %s317_s9, %s317_s9 }
  0x3b   :  { %367 = vmatprep.subr.bf16.mxu0 %v536_v0  ;;  %v65_v11 = vpack.c.bf16 %v64_v10, %v63_v9  ;;  %386 = vmatpush3.bf16.msra.mxu1 %v423_v12  ;;  %v424_v13 = vld [vmem:[#allocation7 + $0x8] sm:$0xff]   ;;  %v425_v14 = vld [vmem:[#allocation7 + $0x10] sm:$0xff]   ;;  %v426_v15 = vld [vmem:[#allocation7 + $0x18] sm:$0xff]   ;;  %p502_p10 = scmp.ne.s32.totalorder %s317_s9, %s501_s10  ;;  %p507_p12 = scmp.lt.s32.totalorder %s501_s10, %s501_s10 }
  0x3c   :  { %387 = vmatprep.subr.bf16.mxu1 %v536_v0  ;;  %v427_v16 = vld [vmem:[#allocation7 + $0x20] sm:$0xff]   ;;  %v428_v17 = vld [vmem:[#allocation7 + $0x28] sm:$0xff]   ;;  %v429_v18 = vld [vmem:[#allocation7 + $0x30] sm:$0xff]  }
  0x3d   :  { %v430_v19 = vld [vmem:[#allocation7 + $0x38] sm:$0xff]   ;;  %v329_v20 = vld [vmem:[%s637_s2] ss:$0 sm:$0xff]  ;;  %p508_p13 = por %p507_p12, %p506_p11 }
  0x3e   :  { %368 = vmatpush3.bf16.msra.mxu0 %v416_v2  ;;  %v338_v46 = vld [vmem:[%s639_s4] ss:$0 sm:$0xff] }
  0x3f   :  { %369 = vmatprep.subr.bf16.mxu0 %v536_v0  ;;  %388 = vmatpush3.bf16.msra.mxu1 %v424_v13  ;;  %p509_p0 = pnand %p508_p13, %p502_p10 }
  0x40   :  { %389 = vmatprep.subr.bf16.mxu1 %v536_v0 }
  0x42   :  { %370 = vmatpush3.bf16.msra.mxu0 %v417_v3 }
  0x43   :  { %371 = vmatprep.subr.bf16.mxu0 %v536_v0  ;;  %390 = vmatpush3.bf16.msra.mxu1 %v425_v14 }
  0x44   :  { %391 = vmatprep.subr.bf16.mxu1 %v536_v0 }
  0x46   :  { %372 = vmatpush3.bf16.msra.mxu0 %v418_v4 }
  0x47   :  { %373 = vmatprep.subr.bf16.mxu0 %v536_v0  ;;  %392 = vmatpush3.bf16.msra.mxu1 %v426_v15 }
  0x48   :  { %393 = vmatprep.subr.bf16.mxu1 %v536_v0 }
  0x4a   :  { %374 = vmatpush3.bf16.msra.mxu0 %v419_v5 }
  0x4b   :  { %375 = vmatprep.subr.bf16.mxu0 %v536_v0  ;;  %394 = vmatpush3.bf16.msra.mxu1 %v427_v16 }
  0x4c   :  { %395 = vmatprep.subr.bf16.mxu1 %v536_v0 }
  0x4e   :  { %376 = vmatpush3.bf16.msra.mxu0 %v420_v6 }
  0x4f   :  { %377 = vmatprep.subr.bf16.mxu0 %v536_v0  ;;  %396 = vmatpush3.bf16.msra.mxu1 %v428_v17 }
  0x50   :  { %397 = vmatprep.subr.bf16.mxu1 %v536_v0 }
  0x52   :  { %378 = vmatpush3.bf16.msra.mxu0 %v421_v7 }
  0x53   :  { %379 = vmatprep.subr.bf16.mxu0 %v536_v0  ;;  %398 = vmatpush3.bf16.msra.mxu1 %v429_v18 }
  0x54   :  { %399 = vmatprep.subr.bf16.mxu1 %v536_v0 }
  0x56   :  { %380 = vmatpush3.bf16.msra.mxu0 %v422_v8 }
  0x57   :  { %400 = vmatpush3.bf16.msra.mxu1 %v430_v19 }
  0x59   :  { %382 = vmatmul.mubr.bf16.vlgmr.msra.gmra.mrb[0].mxu0 %v65_v11 }
 0x12c   :  { %v171_v21 = vpop.f32.mrb[0].mxu0 }
 0x12d   :  { %v172_v22 = vadd.f32 %v329_v20, %v171_v21  ;;  %v383_v23 = vpop.f32.mrb[1].mxu0 }
 0x12e   :  { %v174_v24 = vpop.f32.mrb[2].mxu0 }
 0x12f   :  { %v178_v25 = vmul.f32 %v172_v22, %v172_v22  ;;  %v175_v26 = vadd.f32 %v329_v20, %v174_v24  ;;  %v384_v27 = vpop.f32.mrb[3].mxu0 }
 0x131   :  { %v180_v28 = vmul.f32 %v178_v25, %v172_v22  ;;  %v179_v29 = vmul.f32 %v175_v26, %v175_v26 }
 0x133   :  { %v182_v30 = vmul.f32 0.044715, %v180_v28  ;;  %v181_v31 = vmul.f32 %v179_v29, %v175_v26 }
 0x135   :  { %v184_v32 = vadd.f32 %v182_v30, %v172_v22  ;;  %v183_v33 = vmul.f32 0.044715, %v181_v31 }
 0x137   :  { %v186_v34 = vmul.f32 0.7978846, %v184_v32  ;;  %v185_v35 = vadd.f32 %v183_v33, %v175_v26 }
 0x139   :  { %431 = vtanh.f32 %v186_v34  ;;  %v187_v36 = vmul.f32 0.7978846, %v185_v35 }
 0x13b   :  { %433 = vtanh.f32 %v187_v36 }
 0x143   :  { %v432_v37 = vpop.eup %431 }
 0x144   :  { %v190_v38 = vadd.f32 1.0, %v432_v37 }
 0x145   :  { %v434_v39 = vpop.eup %433 }
 0x146   :  { %v191_v40 = vadd.f32 1.0, %v434_v39  ;;  %v192_v41 = vmul.f32 0.5, %v190_v38 }
 0x148   :  { %v193_v42 = vmul.f32 0.5, %v191_v40  ;;  %v194_v43 = vmul.f32 %v192_v41, %v172_v22 }
 0x14a   :  { %v195_v44 = vmul.f32 %v193_v42, %v175_v26 }
 0x14c   :  { %v196_v45 = vpack.c.bf16 %v195_v44, %v194_v43 }
 0x14e   :  { %402 = vmatmul.mubr.bf16.vlgmr.msra.gmra.mrb[0].mxu1 %v196_v45 }
 0x221   :  { %v302_v47 = vpop.f32.mrb[0].mxu1 }
 0x222   :  { %v303_v48 = vadd.f32 %v338_v46, %v302_v47  ;;  %v403_v49 = vpop.f32.mrb[1].mxu1 }
 0x223   :  { %v305_v50 = vpop.f32.mrb[2].mxu1 }
 0x224   :  { %309 = vst [vmem:[#allocation8] sm:$0xff] %v303_v48  ;;  %v306_v51 = vadd.f32 %v338_v46, %v305_v50  ;;  %v404_v52 = vpop.f32.mrb[3].mxu1 }
 0x226   :  { %310 = vst [vmem:[#allocation8 + $0x8] sm:$0xff] %v306_v51 }
 0x227   :  { %512 = shalt.err (!%p509_p0)
}
 0x228   :  { %s513_s12 = scalar_lea.hbm %s640_s5, 256 }
 0x229   :  { %p514_p1 = scmp.ne.s32.totalorder %s640_s5, %s513_s12  ;;  %p517_p2 = scmp.lt.u32.totalorder %s513_s12, %s640_s5 }
 0x22b   :  { %p519_p3 = pnand %p517_p2, %p514_p1 }
 0x22d   :  { %522 = shalt.err (!%p519_p3)
}
 0x22e   :  { %322 = dma.vmem_to_hbm [thread:$0]  %s317_s9, 256, %s640_s5, [#allocation4], %s533_s1, %s533_s1, %s534_s17  }
 0x22f   :  { %527 = dma.done.wait [#allocation4], 256  }
 0x230   :  { %528 = vsyncadd [#allocation4], 4294967040 }
 0x231   :  { %326 = vsyncpa [#allocation3], 1 }
 0x232   :  { %327 = vsyncpa [#allocation6], 1 }
 0x233   :  { %328 = vsyncpa [#allocation4], 1 }

</bundles_post_ra>
